<compile_context>
chip_gen: v7x
topology: tpu7x:2x2x1
jax: 0.10.0
libtpu: 0.0.40
codegen_flags: <defaults>
</compile_context>

<pallas_src>
import jax
import jax.numpy as jnp
from jax.experimental import pallas as pl
from jax.experimental.pallas import tpu as pltpu


def _round_up(n, m):
    return ((n + m - 1) // m) * m


def self_att_layer(emb_ctx, w1, b1, w2, b2=None, *, tb=None):
    """emb_ctx: [B, T, D] float32; returns [B, D] float32.

    w1: [D, d_att] (pre-transposed for x @ W), b1: [d_att], w2: [d_att].
    b2 is accepted for API compatibility but unused (it cancels in softmax).
    """
    B, T, D = emb_ctx.shape
    d_att = w1.shape[1]
    TD = T * D          # lane-dense input width   (256 for this config)
    TA = T * d_att      # lane-dense hidden width  (128 for this config)

    # ---- Batch-block size ---------------------------------------------------
    # Large blocks amortize per-step pipeline overhead (HBM-bound kernel);
    # keep >= 4 (even) grid steps when B allows it so both v7x TensorCores
    # stay busy.  tb stays a multiple of 8 (sublane tile).
    if tb is None:
        tb = 2048
        while tb > 8 and B < 4 * tb:
            tb //= 2
    tb = max(8, _round_up(tb, 8))
    n_blocks = -(-B // tb)                      # cdiv
    if n_blocks > 1 and n_blocks % 2:
        n_blocks += 1                           # even grid for v7x megacore
    Bp = n_blocks * tb

    # ---- Wrapper-side (free) reshapes / constant folding --------------------
    x = emb_ctx.astype(jnp.float32).reshape(B, TD)      # contiguous -> free
    if Bp != B:
        # Zero rows are harmless: equal scores -> uniform softmax -> weighted
        # sum of zeros is zero; padded rows are sliced off below.
        x = jnp.pad(x, ((0, Bp - B), (0, 0)))

    eye_t = jnp.eye(T, dtype=jnp.float32)
    w1_blk = jnp.kron(eye_t, w1.astype(jnp.float32))                   # (TD, TA)
    b1_t = jnp.tile(b1.astype(jnp.float32).reshape(1, d_att), (1, T))  # (1, TA)
    w2_blk = jnp.kron(eye_t, w2.astype(jnp.float32).reshape(d_att, 1))  # (TA, T)
    e_mat = jnp.kron(eye_t, jnp.ones((1, D), jnp.float32))             # (T, TD)
    r_mat = jnp.kron(jnp.ones((T, 1), jnp.float32),
                     jnp.eye(D, dtype=jnp.float32))                    # (TD, D)
    # b2 intentionally dropped: softmax(s + c) == softmax(s).

    def kernel(x_ref, w1_ref, b1_ref, w2_ref, e_ref, r_ref, out_ref):
        xb = x_ref[...]                                           # (tb, TD)

        # First linear + tanh: one lane-dense MXU matmul (M=tb, K=TD, N=TA).
        h = jnp.tanh(
            jnp.dot(xb, w1_ref[...], preferred_element_type=jnp.float32)
            + b1_ref[...])                                        # (tb, TA)

        # Per-timestep score via block-diagonal w2: (tb, T) on the lane axis.
        s = jnp.dot(h, w2_ref[...], preferred_element_type=jnp.float32)

        # Softmax over the sequence axis (dim=-2 of the PyTorch module).
        s = s - jnp.max(s, axis=-1, keepdims=True)
        e = jnp.exp(s)
        denom = jnp.sum(e, axis=-1, keepdims=True)                # (tb, 1), >= 1
        inv = pl.reciprocal(denom, approx=True)                   # EUP slot
        inv = inv * (2.0 - denom * inv)                           # Newton -> f32
        attn = e * inv                                            # (tb, T)

        # Weighted sum over T, fully lane-dense:
        #   attn_exp[b, t*D+d] = attn[b, t]          (tiny 0/1 MXU matmul)
        #   out[b, d]          = sum_t x[b, t*D+d] * attn_exp[b, t*D+d]
        attn_exp = jnp.dot(attn, e_ref[...],
                           preferred_element_type=jnp.float32)    # (tb, TD)
        out_ref[...] = jnp.dot(xb * attn_exp, r_ref[...],
                               preferred_element_type=jnp.float32)  # (tb, D)

    # ---- Padding-aware VMEM accounting (blocks are double-buffered) ---------
    lane = 128
    x_blk = tb * _round_up(TD, lane) * 4
    out_blk = tb * _round_up(D, lane) * 4
    w_bytes = 4 * (_round_up(TD, 8) * _round_up(TA, lane)        # w1_blk
                   + 8 * _round_up(TA, lane)                     # b1
                   + _round_up(TA, 8) * _round_up(T, lane)       # w2_blk
                   + _round_up(T, 8) * _round_up(TD, lane)       # e_mat
                   + _round_up(TD, 8) * _round_up(D, lane))      # r_mat
    compute_scratch = 8 * tb * _round_up(TD, lane) * 4           # live temporaries
    vmem_limit = 2 * (x_blk + out_blk + w_bytes) + compute_scratch + (2 << 20)
    vmem_limit = int(min(max(vmem_limit, 8 << 20), 112 << 20))

    out = pl.pallas_call(
        kernel,
        out_shape=jax.ShapeDtypeStruct((Bp, D), jnp.float32),
        grid_spec=pltpu.PrefetchScalarGridSpec(
            num_scalar_prefetch=0,
            grid=(n_blocks,),
            in_specs=[
                pl.BlockSpec((tb, TD), lambda b: (b, 0)),
                # Weight/constant blocks have a constant index map: DMA'd once,
                # then the pipeline skips the re-fetch on later steps.
                pl.BlockSpec((TD, TA), lambda b: (0, 0)),
                pl.BlockSpec((1, TA), lambda b: (0, 0)),
                pl.BlockSpec((TA, T), lambda b: (0, 0)),
                pl.BlockSpec((T, TD), lambda b: (0, 0)),
                pl.BlockSpec((TD, D), lambda b: (0, 0)),
            ],
            out_specs=pl.BlockSpec((tb, D), lambda b: (b, 0)),
        ),
        compiler_params=pltpu.CompilerParams(
            dimension_semantics=("parallel",),
            vmem_limit_bytes=vmem_limit,
        ),
    )(x, w1_blk, b1_t, w2_blk, e_mat, r_mat)

    # Wrapper-side slice is free at the XLA level.
    return out[:B]


def self_att_ref(emb_ctx, w1, b1, w2, b2):
    h = jnp.tanh(emb_ctx @ w1 + b1)                       # [B, T, d_att]
    s = h @ w2.reshape(-1, 1) + b2                        # [B, T, 1]
    attn = jax.nn.softmax(s, axis=-2)                     # softmax over T
    return jnp.sum(emb_ctx * attn, axis=1)                # [B, D]


if __name__ == "__main__":
    # Module hyperparams: d_ctx=16 -> input feature dim D = 2*d_ctx = 32, d_att=16
    d_ctx, d_att = 16, 16
    D = 2 * d_ctx
    B, T = 2, 8

    key = jax.random.PRNGKey(0)
    k_x, k_w1, k_b1, k_w2, k_b2 = jax.random.split(key, 5)

    emb_ctx = jax.random.normal(k_x, (B, T, D), dtype=jnp.float32)

    # Deterministic synthetic parameters (shapes follow nn.Linear(2*d_ctx, d_att)
    # and nn.Linear(d_att, 1); stored pre-transposed for x @ W).
    w1 = jax.random.normal(k_w1, (D, d_att), dtype=jnp.float32) * 0.1
    b1 = jax.random.normal(k_b1, (d_att,), dtype=jnp.float32) * 0.1
    w2 = jax.random.normal(k_w2, (d_att,), dtype=jnp.float32) * 0.1
    b2 = jax.random.normal(k_b2, (1,), dtype=jnp.float32) * 0.1

    out = self_att_layer(emb_ctx, w1, b1, w2, b2)
    jax.block_until_ready(out)

    ref = self_att_ref(emb_ctx, w1, b1, w2, b2)
    assert out.shape == (B, D)
    assert jnp.allclose(out, ref, atol=1e-5, rtol=1e-5)

    print("KERNEL_OK")
</pallas_src>

<mosaic_0001>
module attributes {stable_mosaic.version = 11 : i64} {
  func.func @kernel(%arg0: i32, %arg1: memref<8x256xf32, #tpu.memory_space<vmem>>, %arg2: memref<256x128xf32, #tpu.memory_space<vmem>>, %arg3: memref<1x128xf32, #tpu.memory_space<vmem>>, %arg4: memref<128x8xf32, #tpu.memory_space<vmem>>, %arg5: memref<8x256xf32, #tpu.memory_space<vmem>>, %arg6: memref<256x32xf32, #tpu.memory_space<vmem>>, %arg7: memref<8x32xf32, #tpu.memory_space<vmem>>) attributes {dimension_semantics = [#tpu.dimension_semantics<parallel>], iteration_bounds = array<i64: 1>, scalar_prefetch = 0 : i64, scratch_operands = 0 : i64, tpu.core_type = #tpu.core_type<tc>, window_params = [{transform_indices = @transform_0, window_bounds = array<i64: 8, 256>}, {pipeline_mode = #tpu.pipeline_mode<synchronous>, transform_indices = @transform_1, window_bounds = array<i64: 256, 128>}, {pipeline_mode = #tpu.pipeline_mode<synchronous>, transform_indices = @transform_2, window_bounds = array<i64: 1, 128>}, {pipeline_mode = #tpu.pipeline_mode<synchronous>, transform_indices = @transform_3, window_bounds = array<i64: 128, 8>}, {pipeline_mode = #tpu.pipeline_mode<synchronous>, transform_indices = @transform_4, window_bounds = array<i64: 8, 256>}, {pipeline_mode = #tpu.pipeline_mode<synchronous>, transform_indices = @transform_5, window_bounds = array<i64: 256, 32>}, {transform_indices = @transform_6, window_bounds = array<i64: 8, 32>}]} {
    %c0 = arith.constant 0 : index
    %c0_0 = arith.constant 0 : index
    %0 = vector.load %arg1[%c0, %c0_0] : memref<8x256xf32, #tpu.memory_space<vmem>>, vector<8x256xf32>
    %c0_1 = arith.constant 0 : index
    %c0_2 = arith.constant 0 : index
    %1 = vector.load %arg2[%c0_1, %c0_2] : memref<256x128xf32, #tpu.memory_space<vmem>>, vector<256x128xf32>
    %cst = arith.constant dense<0.000000e+00> : vector<8x128xf32>
    %2 = tpu.matmul %0, %1, %cst {dimension_numbers = #tpu.dot_dimension_numbers<[1], [0], [0], [1], [0, 0, 1, 1], [], []>} : vector<8x256xf32>, vector<256x128xf32>, vector<8x128xf32> -> vector<8x128xf32>
    %c0_3 = arith.constant 0 : index
    %c0_4 = arith.constant 0 : index
    %3 = vector.load %arg3[%c0_3, %c0_4] : memref<1x128xf32, #tpu.memory_space<vmem>>, vector<1x128xf32>
    %4 = vector.broadcast %3 : vector<1x128xf32> to vector<8x128xf32>
    %5 = arith.addf %2, %4 : vector<8x128xf32>
    %6 = math.tanh %5 : vector<8x128xf32>
    %c0_5 = arith.constant 0 : index
    %c0_6 = arith.constant 0 : index
    %7 = vector.load %arg4[%c0_5, %c0_6] : memref<128x8xf32, #tpu.memory_space<vmem>>, vector<128x8xf32>
    %cst_7 = arith.constant dense<0.000000e+00> : vector<8x8xf32>
    %8 = tpu.matmul %6, %7, %cst_7 {dimension_numbers = #tpu.dot_dimension_numbers<[1], [0], [0], [1], [0, 0, 1, 1], [], []>} : vector<8x128xf32>, vector<128x8xf32>, vector<8x8xf32> -> vector<8x8xf32>
    %cst_8 = arith.constant dense<0xFF800000> : vector<8xf32>
    %9 = vector.multi_reduction <maximumf>, %8, %cst_8 [1] : vector<8x8xf32> to vector<8xf32>
    %10 = vector.shape_cast %9 : vector<8xf32> to vector<8x1xf32>
    %11 = vector.broadcast %10 : vector<8x1xf32> to vector<8x8xf32>
    %12 = arith.subf %8, %11 : vector<8x8xf32>
    %13 = math.exp %12 : vector<8x8xf32>
    %cst_9 = arith.constant dense<0.000000e+00> : vector<8xf32>
    %14 = vector.multi_reduction <add>, %13, %cst_9 [1] : vector<8x8xf32> to vector<8xf32>
    %15 = vector.shape_cast %14 : vector<8xf32> to vector<8x1xf32>
    %16 = tpu.reciprocal %15 {approx = true} : vector<8x1xf32> -> vector<8x1xf32>
    %17 = arith.mulf %15, %16 : vector<8x1xf32>
    %cst_10 = arith.constant 2.000000e+00 : f32
    %18 = vector.broadcast %cst_10 : f32 to vector<8x1xf32>
    %19 = arith.subf %18, %17 : vector<8x1xf32>
    %20 = arith.mulf %16, %19 : vector<8x1xf32>
    %21 = vector.broadcast %20 : vector<8x1xf32> to vector<8x8xf32>
    %22 = arith.mulf %13, %21 : vector<8x8xf32>
    %c0_11 = arith.constant 0 : index
    %c0_12 = arith.constant 0 : index
    %23 = vector.load %arg5[%c0_11, %c0_12] : memref<8x256xf32, #tpu.memory_space<vmem>>, vector<8x256xf32>
    %cst_13 = arith.constant dense<0.000000e+00> : vector<8x256xf32>
    %24 = tpu.matmul %22, %23, %cst_13 {dimension_numbers = #tpu.dot_dimension_numbers<[1], [0], [0], [1], [0, 0, 1, 1], [], []>} : vector<8x8xf32>, vector<8x256xf32>, vector<8x256xf32> -> vector<8x256xf32>
    %25 = arith.mulf %0, %24 : vector<8x256xf32>
    %c0_14 = arith.constant 0 : index
    %c0_15 = arith.constant 0 : index
    %26 = vector.load %arg6[%c0_14, %c0_15] : memref<256x32xf32, #tpu.memory_space<vmem>>, vector<256x32xf32>
    %cst_16 = arith.constant dense<0.000000e+00> : vector<8x32xf32>
    %27 = tpu.matmul %25, %26, %cst_16 {dimension_numbers = #tpu.dot_dimension_numbers<[1], [0], [0], [1], [0, 0, 1, 1], [], []>} : vector<8x256xf32>, vector<256x32xf32>, vector<8x32xf32> -> vector<8x32xf32>
    %c0_17 = arith.constant 0 : index
    %c0_18 = arith.constant 0 : index
    %28 = vector.load %arg7[%c0_17, %c0_18] : memref<8x32xf32, #tpu.memory_space<vmem>>, vector<8x32xf32>
    tpu.vector_store %arg7[%c0_17, %c0_18], %27 {strides = array<i32>} : memref<8x32xf32, #tpu.memory_space<vmem>>, vector<8x32xf32>,
    return
  }
  func.func @transform_0(%arg0: i32) -> (i32, i32) {
    %c0_i32 = arith.constant 0 : i32
    %c0_i32_0 = arith.constant 0 : i32
    return %arg0, %c0_i32 : i32, i32
  }
  func.func @transform_1(%arg0: i32) -> (i32, i32) {
    %c0_i32 = arith.constant 0 : i32
    %c0_i32_0 = arith.constant 0 : i32
    %c0_i32_1 = arith.constant 0 : i32
    return %c0_i32, %c0_i32_0 : i32, i32
  }
  func.func @transform_2(%arg0: i32) -> (i32, i32) {
    %c0_i32 = arith.constant 0 : i32
    %c0_i32_0 = arith.constant 0 : i32
    %c0_i32_1 = arith.constant 0 : i32
    return %c0_i32, %c0_i32_0 : i32, i32
  }
  func.func @transform_3(%arg0: i32) -> (i32, i32) {
    %c0_i32 = arith.constant 0 : i32
    %c0_i32_0 = arith.constant 0 : i32
    %c0_i32_1 = arith.constant 0 : i32
    return %c0_i32, %c0_i32_0 : i32, i32
  }
  func.func @transform_4(%arg0: i32) -> (i32, i32) {
    %c0_i32 = arith.constant 0 : i32
    %c0_i32_0 = arith.constant 0 : i32
    %c0_i32_1 = arith.constant 0 : i32
    return %c0_i32, %c0_i32_0 : i32, i32
  }
  func.func @transform_5(%arg0: i32) -> (i32, i32) {
    %c0_i32 = arith.constant 0 : i32
    %c0_i32_0 = arith.constant 0 : i32
    %c0_i32_1 = arith.constant 0 : i32
    return %c0_i32, %c0_i32_0 : i32, i32
  }
  func.func @transform_6(%arg0: i32) -> (i32, i32) {
    %c0_i32 = arith.constant 0 : i32
    %c0_i32_0 = arith.constant 0 : i32
    return %arg0, %c0_i32 : i32, i32
  }
}

</mosaic_0001>

<bundles_post_ra>
// kernel: tpu_custom_call.1
= control target key start
LH: loop header
LB: loop body
LE: loop exit
PB: predicated region body
PF: predicated region fallthrough
CT: control target
= control target key end

     0   :  { %v679_v7 = vmov 0.0|0.0   ;;  %s1008_s0 = inlined_call_operand.vmem [shape: f32[8,256], index: 0, kind: input, shape index: {}]   ;;  %s1009_s1 = inlined_call_operand.vmem [shape: f32[256,128], index: 1, kind: input, shape index: {}]   ;;  %s1010_s2 = inlined_call_operand.vmem [shape: f32[1,128], index: 2, kind: input, shape index: {}]   ;;  %s1011_s3 = inlined_call_operand.vmem [shape: f32[128,8], index: 3, kind: input, shape index: {}]   ;;  %s1012_s4 = inlined_call_operand.vmem [shape: f32[8,256], index: 4, kind: input, shape index: {}]   ;;  %s1013_s5 = inlined_call_operand.vmem [shape: f32[256,32], index: 5, kind: input, shape index: {}]   ;;  %s1014_s6 = inlined_call_operand.hbm [shape: f32[8,32], index: 6, kind: output, shape index: {}]  }
   0x1   :  { %v42_v0 = vld [vmem:[%s1009_s1 + $0x80] sm:$0xff]  ;;  %v43_v1 = vld [vmem:[%s1009_s1 + $0x88] sm:$0xff]  ;;  %v44_v5 = vld [vmem:[%s1009_s1 + $0x90] sm:$0xff]  ;;  %589 = vmatprep.subr.bf16.mxu1 %v679_v7 }
   0x2   :  { %v26_v2 = vld [vmem:[%s1009_s1] sm:$0xff]  ;;  %v557_v3 = vpack.c.bf16 %v43_v1, %v42_v0  ;;  %v27_v4 = vld [vmem:[%s1009_s1 + $0x8] sm:$0xff]  ;;  %v45_v6 = vld [vmem:[%s1009_s1 + $0x98] sm:$0xff] }
   0x3   :  { %v559_v8 = vpack.c.bf16 %v27_v4, %v26_v2  ;;  %v561_v9 = vpack.c.bf16 %v45_v6, %v44_v5  ;;  %v28_v10 = vld [vmem:[%s1009_s1 + $0x10] sm:$0xff]  ;;  %v29_v11 = vld [vmem:[%s1009_s1 + $0x18] sm:$0xff]  ;;  %v46_v12 = vld [vmem:[%s1009_s1 + $0xa0] sm:$0xff] }
   0x4   :  { %558 = vmatprep.subr.bf16.mxu0 %v557_v3  ;;  %v47_v13 = vld [vmem:[%s1009_s1 + $0xa8] sm:$0xff]  ;;  %v563_v14 = vpack.c.bf16 %v29_v11, %v28_v10  ;;  %v30_v16 = vld [vmem:[%s1009_s1 + $0x20] sm:$0xff]  ;;  %v48_v18 = vld [vmem:[%s1009_s1 + $0xb0] sm:$0xff] }
   0x5   :  { %560 = vmatpush3.bf16.msra.mxu0 %v559_v8  ;;  %v565_v15 = vpack.c.bf16 %v47_v13, %v46_v12  ;;  %v31_v17 = vld [vmem:[%s1009_s1 + $0x28] sm:$0xff]  ;;  %v49_v19 = vld [vmem:[%s1009_s1 + $0xb8] sm:$0xff]  ;;  %v32_v22 = vld [vmem:[%s1009_s1 + $0x30] sm:$0xff] }
   0x6   :  { %562 = vmatprep.subr.bf16.mxu0 %v561_v9  ;;  %v567_v20 = vpack.c.bf16 %v31_v17, %v30_v16  ;;  %v569_v21 = vpack.c.bf16 %v49_v19, %v48_v18  ;;  %v33_v23 = vld [vmem:[%s1009_s1 + $0x38] sm:$0xff]  ;;  %v50_v24 = vld [vmem:[%s1009_s1 + $0xc0] sm:$0xff]  ;;  %v51_v25 = vld [vmem:[%s1009_s1 + $0xc8] sm:$0xff] }
   0x7   :  { %v776_v26 = vld [vmem:[%s1008_s0 + $0x8] sm:$0xff]  ;;  %v136_v27 = vld [vmem:[%s1011_s3] sm:$0xff]  ;;  %v571_v29 = vpack.c.bf16 %v33_v23, %v32_v22  ;;  %v138_v31 = vld [vmem:[%s1011_s3 + $0x10] sm:$0xff]  ;;  %v573_v33 = vpack.c.bf16 %v51_v25, %v50_v24 }
   0x8   :  { %129 = vmatprep.mubr.f32.mxu0 %v776_v26  ;;  %v137_v28 = vld [vmem:[%s1011_s3 + $0x8] sm:$0xff]  ;;  %v139_v32 = vld [vmem:[%s1011_s3 + $0x18] sm:$0xff]  ;;  %v34_v34 = vld [vmem:[%s1009_s1 + $0x40] sm:$0xff] }
   0x9   :  { %564 = vmatpush3.bf16.msra.mxu0 %v563_v14  ;;  %v590_v30 = vpack.c.bf16 %v137_v28, %v136_v27  ;;  %v35_v35 = vld [vmem:[%s1009_s1 + $0x48] sm:$0xff]  ;;  %v52_v36 = vld [vmem:[%s1009_s1 + $0xd0] sm:$0xff]  ;;  %v53_v37 = vld [vmem:[%s1009_s1 + $0xd8] sm:$0xff]  ;;  %v593_v38 = vpack.c.bf16 %v139_v32, %v138_v31 }
   0xa   :  { %566 = vmatprep.subr.bf16.mxu0 %v565_v15 }
   0xb   :  { %591 = vmatpush3.bf16.msra.mxu1 %v590_v30 }
   0xd   :  { %568 = vmatpush3.bf16.msra.mxu0 %v567_v20 }
   0xe   :  { %570 = vmatprep.subr.bf16.mxu0 %v569_v21 }
   0xf   :  { %11 = vsyncpa [#allocation3], 0  ;;  %592 = vmatprep.subr.bf16.mxu1 %v679_v7  ;;  %v140_v39 = vld [vmem:[%s1011_s3 + $0x20] sm:$0xff]  ;;  %v141_v40 = vld [vmem:[%s1011_s3 + $0x28] sm:$0xff]  ;;  %v575_v41 = vpack.c.bf16 %v35_v35, %v34_v34  ;;  %v577_v42 = vpack.c.bf16 %v53_v37, %v52_v36  ;;  %vm680_vm0 = vmmov 0   ;;  %v681_v11 = vmov 0.0  }
  0x10   :  { %v36_v43 = vld [vmem:[%s1009_s1 + $0x50] sm:$0xff]  ;;  %v37_v44 = vld [vmem:[%s1009_s1 + $0x58] sm:$0xff]  ;;  %v54_v45 = vld [vmem:[%s1009_s1 + $0xe0] sm:$0xff]  ;;  %594 = vmatpush3.bf16.msra.mxu1 %v593_v38  ;;  %v596_v47 = vpack.c.bf16 %v141_v40, %v140_v39  ;;  %554 = vmatprep.mubr.msk.f32.mxu1 %vm680_vm0, %v681_v11  ;;  %vm222_vm1 = vcmask 64512   ;;  %s682_s9 = smov [#allocation2]   ;;  %vm417_vm2 = vcmask 261120  }
  0x11   :  { %572 = vmatpush3.bf16.msra.mxu0 %v571_v29  ;;  %v55_v46 = vld [vmem:[%s1009_s1 + $0xe8] sm:$0xff]  ;;  %595 = vmatprep.subr.bf16.mxu1 %v679_v7  ;;  %v142_v48 = vld [vmem:[%s1011_s3 + $0x30] sm:$0xff]  ;;  %v143_v49 = vld [vmem:[%s1011_s3 + $0x38] sm:$0xff]  ;;  %v579_v50 = vpack.c.bf16 %v37_v44, %v36_v43  ;;  %s425_s10 = sshll.u32 %s682_s9, 4  ;;  %s426_s10 = int_to_ptr.vmem [resolvable:$true] %s425_s10 }
  0x12   :  { %574 = vmatprep.subr.bf16.mxu0 %v573_v33  ;;  %v581_v51 = vpack.c.bf16 %v55_v46, %v54_v45  ;;  %v38_v52 = vld [vmem:[%s1009_s1 + $0x60] sm:$0xff]  ;;  %v39_v53 = vld [vmem:[%s1009_s1 + $0x68] sm:$0xff]  ;;  %v56_v54 = vld [vmem:[%s1009_s1 + $0xf0] sm:$0xff]  ;;  %v599_v56 = vpack.c.bf16 %v143_v49, %v142_v48  ;;  %p660_p1 = scmp.lt.s32.totalorder %s426_s10, %s426_s10 }
  0x13   :  { %v57_v55 = vld [vmem:[%s1009_s1 + $0xf8] sm:$0xff]  ;;  %v583_v57 = vpack.c.bf16 %v39_v53, %v38_v52  ;;  %v40_v59 = vld [vmem:[%s1009_s1 + $0x70] sm:$0xff]  ;;  %v852_v62 = vld [vmem:[%s1008_s0] sm:$0xff] }
  0x14   :  { %597 = vmatpush3.bf16.msra.mxu1 %v596_v47  ;;  %v585_v58 = vpack.c.bf16 %v57_v55, %v56_v54  ;;  %v41_v60 = vld [vmem:[%s1009_s1 + $0x78] sm:$0xff]  ;;  %v144_v63 = vld [vmem:[%s1011_s3 + $0x40] sm:$0xff]  ;;  %v145_v0 = vld [vmem:[%s1011_s3 + $0x48] sm:$0xff] }
  0x15   :  { %576 = vmatpush3.bf16.msra.mxu0 %v575_v41  ;;  %598 = vmatprep.subr.bf16.mxu1 %v679_v7  ;;  %v587_v61 = vpack.c.bf16 %v41_v60, %v40_v59  ;;  %v602_v1 = vpack.c.bf16 %v145_v0, %v144_v63  ;;  %v146_v2 = vld [vmem:[%s1011_s3 + $0x50] sm:$0xff]  ;;  %v147_v3 = vld [vmem:[%s1011_s3 + $0x58] sm:$0xff]  ;;  %v148_v5 = vld [vmem:[%s1011_s3 + $0x60] sm:$0xff] }
  0x16   :  { %578 = vmatprep.subr.bf16.mxu0 %v577_v42  ;;  %v605_v4 = vpack.c.bf16 %v147_v3, %v146_v2  ;;  %v149_v6 = vld [vmem:[%s1011_s3 + $0x68] sm:$0xff]  ;;  %v150_v9 = vld [vmem:[%s1011_s3 + $0x70] sm:$0xff]  ;;  %v151_v10 = vld [vmem:[%s1011_s3 + $0x78] sm:$0xff] }
  0x17   :  { %v608_v8 = vpack.c.bf16 %v149_v6, %v148_v5  ;;  %v611_v12 = vpack.c.bf16 %v151_v10, %v150_v9  ;;  %v433_v14 = vld [vmem:[%s1010_s2] ss:$0 sm:$0xff]  ;;  %v238_v27 = vld [vmem:[%s1012_s4 + $0x8] sm:$0xff]  ;;  %v333_v34 = vld [vmem:[%s1013_s5 + $0x90] sm:$0xff] }
  0x18   :  { %600 = vmatpush3.bf16.msra.mxu1 %v599_v56  ;;  %v237_v28 = vld [vmem:[%s1012_s4] sm:$0xff]  ;;  %v332_v30 = vld [vmem:[%s1013_s5 + $0x88] sm:$0xff]  ;;  %v334_v35 = vld [vmem:[%s1013_s5 + $0x98] sm:$0xff] }
  0x19   :  { %580 = vmatpush3.bf16.msra.mxu0 %v579_v50  ;;  %601 = vmatprep.subr.bf16.mxu1 %v679_v7  ;;  %v331_v29 = vld [vmem:[%s1013_s5 + $0x80] sm:$0xff]  ;;  %v316_v33 = vld [vmem:[%s1013_s5 + $0x8] sm:$0xff]  ;;  %v617_v37 = vpack.c.bf16 %v334_v35, %v333_v34  ;;  %v317_v38 = vld [vmem:[%s1013_s5 + $0x10] sm:$0xff] }
  0x1a   :  { %582 = vmatprep.subr.bf16.mxu0 %v581_v51  ;;  %v315_v31 = vld [vmem:[%s1013_s5] sm:$0xff]  ;;  %v613_v32 = vpack.c.bf16 %v332_v30, %v331_v29  ;;  %v318_v39 = vld [vmem:[%s1013_s5 + $0x18] sm:$0xff]  ;;  %v336_v41 = vld [vmem:[%s1013_s5 + $0xa8] sm:$0xff] }
  0x1b   :  { %v615_v36 = vpack.c.bf16 %v316_v33, %v315_v31  ;;  %v335_v40 = vld [vmem:[%s1013_s5 + $0xa0] sm:$0xff]  ;;  %v619_v42 = vpack.c.bf16 %v318_v39, %v317_v38  ;;  %v320_v45 = vld [vmem:[%s1013_s5 + $0x28] sm:$0xff]  ;;  %v337_v46 = vld [vmem:[%s1013_s5 + $0xb0] sm:$0xff] }
  0x1c   :  { %603 = vmatpush3.bf16.msra.mxu1 %v602_v1  ;;  %v621_v43 = vpack.c.bf16 %v336_v41, %v335_v40  ;;  %v319_v44 = vld [vmem:[%s1013_s5 + $0x20] sm:$0xff]  ;;  %v338_v47 = vld [vmem:[%s1013_s5 + $0xb8] sm:$0xff]  ;;  %v321_v50 = vld [vmem:[%s1013_s5 + $0x30] sm:$0xff] }
  0x1d   :  { %584 = vmatpush3.bf16.msra.mxu0 %v583_v57  ;;  %604 = vmatprep.subr.bf16.mxu1 %v679_v7  ;;  %v623_v48 = vpack.c.bf16 %v320_v45, %v319_v44  ;;  %v625_v49 = vpack.c.bf16 %v338_v47, %v337_v46  ;;  %v322_v51 = vld [vmem:[%s1013_s5 + $0x38] sm:$0xff]  ;;  %v339_v52 = vld [vmem:[%s1013_s5 + $0xc0] sm:$0xff]  ;;  %v340_v53 = vld [vmem:[%s1013_s5 + $0xc8] sm:$0xff] }
  0x1e   :  { %586 = vmatprep.subr.bf16.mxu0 %v585_v58  ;;  %v627_v54 = vpack.c.bf16 %v322_v51, %v321_v50  ;;  %v629_v55 = vpack.c.bf16 %v340_v53, %v339_v52  ;;  %v323_v56 = vld [vmem:[%s1013_s5 + $0x40] sm:$0xff]  ;;  %v324_v57 = vld [vmem:[%s1013_s5 + $0x48] sm:$0xff]  ;;  %v341_v58 = vld [vmem:[%s1013_s5 + $0xd0] sm:$0xff] }
  0x1f   :  { %v342_v59 = vld [vmem:[%s1013_s5 + $0xd8] sm:$0xff]  ;;  %v631_v60 = vpack.c.bf16 %v324_v57, %v323_v56  ;;  %v325_v63 = vld [vmem:[%s1013_s5 + $0x50] sm:$0xff]  ;;  %v343_v1 = vld [vmem:[%s1013_s5 + $0xe0] sm:$0xff] }
  0x20   :  { %606 = vmatpush3.bf16.msra.mxu1 %v605_v4  ;;  %v326_v0 = vld [vmem:[%s1013_s5 + $0x58] sm:$0xff]  ;;  %v344_v2 = vld [vmem:[%s1013_s5 + $0xe8] sm:$0xff]  ;;  %v327_v5 = vld [vmem:[%s1013_s5 + $0x60] sm:$0xff] }
  0x21   :  { %588 = vmatpush3.bf16.msra.mxu0 %v587_v61  ;;  %607 = vmatprep.subr.bf16.mxu1 %v679_v7  ;;  %v633_v61 = vpack.c.bf16 %v342_v59, %v341_v58  ;;  %v635_v3 = vpack.c.bf16 %v326_v0, %v325_v63  ;;  %v637_v4 = vpack.c.bf16 %v344_v2, %v343_v1  ;;  %v328_v6 = vld [vmem:[%s1013_s5 + $0x68] sm:$0xff] }
  0x22   :  { %242 = vmatprep.subr.mxu0 %v238_v27 }
  0x24   :  { %130 = vmatmul.mubr.f32.vlgmr.msra.gmra.mrb[0].mxu0 %v852_v62  ;;  %609 = vmatpush3.bf16.msra.mxu1 %v608_v8  ;;  %v639_v8 = vpack.c.bf16 %v328_v6, %v327_v5 }
  0x25   :  { %306 = vmatprep.mubr.f32.mxu0 %v681_v11  ;;  %610 = vmatprep.subr.bf16.mxu1 %v679_v7 }
  0x26   :  { %243 = vmatpush1.msra.mxu0 %v237_v28 }
  0x28   :  { %612 = vmatpush3.bf16.msra.mxu1 %v611_v12 }
  0x29   :  { %614 = vmatprep.subr.bf16.mxu1 %v613_v32 }
  0xf7   :  { %v467_v13 = vpop.f32.mrb[0].mxu0 }
  0xf8   :  { %v468_v15 = vpop.f32.mrb[1].mxu0 }
  0xf9   :  { %v469_v16 = vadd.f32 %v468_v15, %v467_v13  ;;  %v345_v15 = vld [vmem:[%s1013_s5 + $0xf0] sm:$0xff] }
  0xfb   :  { %v132_v17 = vadd.f32 %v469_v16, %v433_v14  ;;  %v346_v16 = vld [vmem:[%s1013_s5 + $0xf8] sm:$0xff] }
  0xfd   :  { %649 = vtanh.f32 %v132_v17  ;;  %v641_v17 = vpack.c.bf16 %v346_v16, %v345_v15 }
 0x107   :  { %v650_v18 = vpop.eup %649 }
 0x108   :  { %555 = vmatmul.mubr.f32.vlgmr.msra.gmra.mrb[0].mxu1 %v650_v18  ;;  %v329_v18 = vld [vmem:[%s1013_s5 + $0x70] sm:$0xff] }
 0x109   :  { %616 = vmatpush3.bf16.msra.mxu1 %v615_v36 }
 0x10a   :  { %618 = vmatprep.subr.bf16.mxu1 %v617_v37 }
 0x10d   :  { %620 = vmatpush3.bf16.msra.mxu1 %v619_v42 }
 0x10e   :  { %622 = vmatprep.subr.bf16.mxu1 %v621_v43 }
 0x111   :  { %624 = vmatpush3.bf16.msra.mxu1 %v623_v48 }
 0x112   :  { %626 = vmatprep.subr.bf16.mxu1 %v625_v49 }
 0x115   :  { %628 = vmatpush3.bf16.msra.mxu1 %v627_v54 }
 0x116   :  { %630 = vmatprep.subr.bf16.mxu1 %v629_v55 }
 0x119   :  { %632 = vmatpush3.bf16.msra.mxu1 %v631_v60 }
 0x11a   :  { %634 = vmatprep.subr.bf16.mxu1 %v633_v61 }
 0x11d   :  { %636 = vmatpush3.bf16.msra.mxu1 %v635_v3 }
 0x11e   :  { %638 = vmatprep.subr.bf16.mxu1 %v637_v4 }
 0x121   :  { %640 = vmatpush3.bf16.msra.mxu1 %v639_v8 }
 0x122   :  { %642 = vmatprep.subr.bf16.mxu1 %v641_v17 }
 0x1db   :  { %v218_v19 = vpop.f32.mrb[0].mxu1 }
 0x1dc   :  { %v556_v20 = vpop.f32.mrb[1].mxu1  ;;  %v223_v21 = vsel %vm222_vm1, %v218_v19, -inf }
 0x1dd   :  { %224 = vmax.xlane.f32.xlu0 %v223_v21 }
 0x26a   :  { %v225_v22 = vpop.xlane.xlu0 %224 }
 0x26b   :  { %v226_v7 = vsub.f32 %v218_v19, %v225_v22  ;;  %v330_v19 = vld [vmem:[%s1013_s5 + $0x78] sm:$0xff]  ;;  %s655_s5 = scalar_lea.vmem %s426_s10, 128 }
 0x26c   :  { %v643_v20 = vpack.c.bf16 %v330_v19, %v329_v18  ;;  %p656_p0 = scmp.ne.s32.totalorder %s426_s10, %s655_s5  ;;  %p661_p2 = scmp.lt.s32.totalorder %s655_s5, %s655_s5 }
 0x26d   :  { %v227_v23 = vmul.f32 1.442695, %v226_v7 }
 0x26e   :  { %644 = vmatpush3.bf16.msra.mxu1 %v643_v20  ;;  %p662_p3 = por %p661_p2, %p660_p1 }
 0x26f   :  { %651 = vpow2.f32 %v227_v23 }
 0x270   :  { %p663_p4 = pnand %p662_p3, %p656_p0 }
 0x279   :  { %v886_v24 = vpop.eup %651 }
 0x27a   :  { %v229_v25 = vsel %vm222_vm1, %v886_v24, 0.0 }
 0x27b   :  { %230 = vadd.xlane.f32.xlu0 %v229_v25 }
 0x308   :  { %v231_v9 = vpop.xlane.xlu0 %230 }
 0x309   :  { %653 = vrcp.f32 %v231_v9 }
 0x313   :  { %v654_v10 = vpop.eup %653 }
 0x314   :  { %v233_v11 = vmul.f32 %v654_v10, %v231_v9 }
 0x316   :  { %v234_v12 = vsub.f32 2.0, %v233_v11 }
 0x318   :  { %v235_v13 = vmul.f32 %v654_v10, %v234_v12 }
 0x31a   :  { %v236_v14 = vmul.f32 %v886_v24, %v235_v13 }
 0x31c   :  { %434 = vmatmul.mubr.msk.f32.vlgmr.msra.gmra.mrb[2].mxu0 %vm222_vm1, %v236_v14 }
 0x3ef   :  { %v308_v21 = vpop.f32.mrb[2].mxu0 }
 0x3f0   :  { %v310_v22 = vpop.f32.mrb[3].mxu0  ;;  %v313_v23 = vmul.f32 %v308_v21, %v852_v62 }
 0x3f1   :  { %v314_v7 = vmul.f32 %v310_v22, %v776_v26 }
 0x3f3   :  { %411 = vmatprep.mubr.f32.mxu1 %v314_v7 }
 0x3f4   :  { %412 = vmatmul.mubr.f32.vlgmr.msra.gmra.mrb[2].mxu1 %v313_v23 }
 0x4c7   :  { %v519_v24 = vpop.f32.mrb[2].mxu1 }
 0x4c8   :  { %v520_v25 = vpop.f32.mrb[3].mxu1 }
 0x4c9   :  { %v521_v27 = vadd.f32 %v520_v25, %v519_v24 }
 0x4cb   :  { %418 = vst.msk [vmem:[#allocation2] sm:$0xff] %vm417_vm2, %v521_v27 }
 0x4cc   :  { %666 = shalt.err (!%p663_p4)
}
 0x4cd   :  { %s667_s1 = scalar_lea.hbm %s1014_s6, 128 }
 0x4ce   :  { %p668_p5 = scmp.ne.s32.totalorder %s1014_s6, %s667_s1  ;;  %p671_p6 = scmp.lt.u32.totalorder %s667_s1, %s1014_s6 }
 0x4d0   :  { %p673_p7 = pnand %p671_p6, %p668_p5 }
 0x4d2   :  { %676 = shalt.err (!%p673_p7)
}
 0x4d3   :  { %428 = dma.vmem_to_hbm [thread:$0]  %s426_s10, 128, %s1014_s6, [#allocation3]  }
 0x4d4   :  { %677 = dma.done.wait [#allocation3], 128  }
 0x4d5   :  { %678 = vsyncadd [#allocation3], 4294967168 }
 0x4d6   :  { %432 = vsyncpa [#allocation3], 1 }

</bundles_post_ra>
